<compile_context>
chip_gen: v7x
topology: tpu7x:2x2x1
jax: 0.10.0
libtpu: 0.0.40
codegen_flags: <defaults>
</compile_context>

<pallas_src>
import math

import jax
import jax.numpy as jnp
from jax.experimental import pallas as pl
from jax.experimental.pallas import tpu as pltpu


def _round_up(x, m):
    return (x + m - 1) // m * m


_SQRT_2_OVER_PI = math.sqrt(2.0 / math.pi)


def _gelu_tanh(x):
    # tanh-form GELU: 0.5*x*(1+tanh(sqrt(2/pi)*(x+0.044715*x^3))).
    # One EUP tanh + a handful of VALU ops per element (vs ~19 VALU + exp +
    # recip for the exact-erf polynomial). PyTorch nn.GELU() default is the
    # exact form; worst-case deviation is ~3e-3 absolute — documented and
    # covered by the test tolerance.
    x3 = x * x * x
    return 0.5 * x * (1.0 + jnp.tanh(_SQRT_2_OVER_PI * (x + 0.044715 * x3)))


def fusion_kernel(ehr_ref, text_ref, wc_ref, wt_ref, b1_ref, w2_ref, b2_ref,
                  out_ref):
    # Merge layer 1 with ehr_proj / mean / concat folded into the weights:
    #   h = GELU(ehr_flat @ W_comb + text @ W1t + b_comb)
    h = (jnp.dot(ehr_ref[...].astype(jnp.bfloat16), wc_ref[...],
                 preferred_element_type=jnp.float32)
         + jnp.dot(text_ref[...].astype(jnp.bfloat16), wt_ref[...],
                   preferred_element_type=jnp.float32)
         + b1_ref[...])
    h = _gelu_tanh(h)

    # Merge layer 2 + GELU (output dim zero-padded to a 128-lane multiple so
    # the store is an unmasked, lane-dense vst).
    h = jnp.dot(h.astype(jnp.bfloat16), w2_ref[...],
                preferred_element_type=jnp.float32) + b2_ref[...]
    out_ref[...] = _gelu_tanh(h).astype(out_ref.dtype)


def concat_fusion_forward(ehr, text, params, *, block_b=1024):
    """Batch-tiled forward.  block_b rows per grid step (rounded to a multiple
    of 8); all weights/biases stay VMEM-resident across grid steps (constant
    index_maps).  Per-row activation footprint after flattening is ~1 KB, so
    tiles of a few thousand rows fit even v7x's 64 MiB VMEM."""
    B, N, E = ehr.shape
    NE = N * E
    Tm = text.shape[1]
    M = params["w_proj"].shape[1]

    # ---- weight folding (tiny, f32, wrapper side) --------------------------
    wp, bp = params["w_proj"], params["b_proj"]
    w1, b1 = params["w1"], params["b1"]
    w2, b2 = params["w2"], params["b2"]
    w1e, w1t = w1[:M], w1[M:]
    # mean_N(ehr @ Wp + bp) @ W1e == ehr_flat @ tile((1/N)*Wp@W1e) + bp@W1e
    w_comb = jnp.tile((wp @ w1e) * (1.0 / N), (N, 1))     # (N*E, M) f32
    b_comb = bp @ w1e + b1                                 # (1, M)   f32

    # Lane-dense output: pad the final projection to a multiple of 128 lanes
    # (padded columns are exactly GELU(0) = 0 and are sliced off below).
    Mp = _round_up(M, 128)
    if Mp != M:
        w2 = jnp.pad(w2, ((0, 0), (0, Mp - M)))
        b2 = jnp.pad(b2, ((0, 0), (0, Mp - M)))

    # bf16 MXU operands (f32 accumulation in-kernel); biases stay f32.
    w_comb_b = w_comb.astype(jnp.bfloat16)
    w1t_b = w1t.astype(jnp.bfloat16)
    w2_b = w2.astype(jnp.bfloat16)

    # Row-major (B, N, E) -> (B, N*E) is a free reshape (no HBM copy).
    ehr_flat = ehr.reshape(B, NE)

    # ---- batch tiling -------------------------------------------------------
    block_b = _round_up(max(block_b, 8), 8)
    tb = min(block_b, _round_up(B, 8))
    if B > 8 and tb >= _round_up(B, 8):
        # A single-step grid would leave one of v7x's two TensorCores idle:
        # split the batch so the grid has at least two steps.
        tb = _round_up(pl.cdiv(B, 2), 8)
    grid = (pl.cdiv(B, tb),)   # ragged trailing block handled by Pallas masking

    def batch_spec(cols):
        return pl.BlockSpec((tb, cols), lambda i: (i, 0))

    def resident_spec(shape):
        nd = len(shape)
        return pl.BlockSpec(tuple(shape), lambda i, _nd=nd: (0,) * _nd)

    flops = B * (2 * NE * M + 2 * Tm * M + 2 * M * Mp + 20 * (M + Mp))
    cost = pl.CostEstimate(
        flops=int(flops),
        transcendentals=int(B * (M + Mp)),        # one tanh per GELU element
        bytes_accessed=int(ehr_flat.size * ehr_flat.dtype.itemsize
                           + text.size * text.dtype.itemsize
                           + B * Mp * 4
                           + (w_comb_b.size + w1t_b.size + w2_b.size) * 2
                           + (b_comb.size + b2.size) * 4))

    out = pl.pallas_call(
        fusion_kernel,
        out_shape=jax.ShapeDtypeStruct((B, Mp), jnp.float32),
        grid=grid,
        in_specs=[batch_spec(NE), batch_spec(Tm),
                  resident_spec(w_comb_b.shape), resident_spec(w1t_b.shape),
                  resident_spec(b_comb.shape), resident_spec(w2_b.shape),
                  resident_spec(b2.shape)],
        out_specs=batch_spec(Mp),
        compiler_params=pltpu.CompilerParams(
            dimension_semantics=("parallel",)),    # batch tiles independent
        cost_estimate=cost,
    )(ehr_flat, text, w_comb_b, w1t_b, b_comb, w2_b, b2)

    return out if Mp == M else out[:, :M]


def reference_forward(ehr, text, params):
    # Pure-f32, PyTorch-faithful reference (exact-erf GELU).
    proj = ehr @ params["w_proj"] + params["b_proj"][0]
    ehr_mean = proj.mean(axis=1)
    merge_in = jnp.concatenate([ehr_mean, text], axis=-1)
    h = jax.nn.gelu(merge_in @ params["w1"] + params["b1"][0], approximate=False)
    return jax.nn.gelu(h @ params["w2"] + params["b2"][0], approximate=False)


def init_params(key, ehr_embed_dim, merge_embed_dim):
    # Deterministic synthetic init (PyTorch Linear-style uniform bounds).
    ks = jax.random.split(key, 6)

    def lin(kw, kb, fan_in, fan_out):
        bound = 1.0 / math.sqrt(fan_in)
        w = jax.random.uniform(kw, (fan_in, fan_out), jnp.float32, -bound, bound)
        b = jax.random.uniform(kb, (1, fan_out), jnp.float32, -bound, bound)
        return w, b

    w_proj, b_proj = lin(ks[0], ks[1], ehr_embed_dim, merge_embed_dim)
    w1, b1 = lin(ks[2], ks[3], merge_embed_dim * 2, merge_embed_dim)
    w2, b2 = lin(ks[4], ks[5], merge_embed_dim, merge_embed_dim)
    return {"w_proj": w_proj, "b_proj": b_proj,
            "w1": w1, "b1": b1, "w2": w2, "b2": b2}


if __name__ == "__main__":
    B = 20                # batch (not a multiple of the tile -> ragged tail block)
    NUM_MODELS = 3        # num_models (dim averaged over)
    EHR_DIM = 32          # ehr_embed_dim
    MERGE_DIM = 64        # merge_embed_dim (== text dim fed to forward)

    key = jax.random.PRNGKey(0)
    k_ehr, k_text, k_params = jax.random.split(key, 3)

    ehr_list = jax.random.normal(k_ehr, (B, NUM_MODELS, EHR_DIM), jnp.float32)
    text = jax.random.normal(k_text, (B, MERGE_DIM), jnp.float32)
    params = init_params(k_params, EHR_DIM, MERGE_DIM)

    ref = jax.block_until_ready(reference_forward(ehr_list, text, params))

    # block_b=8: multi-step grid with a masked ragged trailing block (20 = 2*8+4).
    out_small = jax.block_until_ready(
        concat_fusion_forward(ehr_list, text, params, block_b=8))
    # default block_b: tile auto-split so the grid still has >=2 steps.
    out_big = jax.block_until_ready(
        concat_fusion_forward(ehr_list, text, params))

    assert out_small.shape == (B, MERGE_DIM)
    assert out_big.shape == (B, MERGE_DIM)
    # Tolerance covers bf16 MXU operands + tanh-form GELU vs. the exact-erf
    # f32 reference; observed end-to-end error is a few 1e-3.
    assert jnp.allclose(out_small, ref, rtol=2e-2, atol=2e-2), "mismatch (tiled)"
    assert jnp.allclose(out_big, ref, rtol=2e-2, atol=2e-2), "mismatch (default)"

    print("KERNEL_OK")
</pallas_src>

<mosaic_0001>
module attributes {stable_mosaic.version = 11 : i64} {
  func.func @fusion_kernel(%arg0: i32, %arg1: memref<8x96xf32, #tpu.memory_space<vmem>>, %arg2: memref<8x64xf32, #tpu.memory_space<vmem>>, %arg3: memref<96x64xbf16, #tpu.memory_space<vmem>>, %arg4: memref<64x64xbf16, #tpu.memory_space<vmem>>, %arg5: memref<1x64xf32, #tpu.memory_space<vmem>>, %arg6: memref<64x128xbf16, #tpu.memory_space<vmem>>, %arg7: memref<1x128xf32, #tpu.memory_space<vmem>>, %arg8: memref<8x128xf32, #tpu.memory_space<vmem>>) attributes {dimension_semantics = [#tpu.dimension_semantics<parallel>], iteration_bounds = array<i64: 3>, scalar_prefetch = 0 : i64, scratch_operands = 0 : i64, tpu.core_type = #tpu.core_type<tc>, window_params = [{transform_indices = @transform_0, window_bounds = array<i64: 8, 96>}, {transform_indices = @transform_1, window_bounds = array<i64: 8, 64>}, {pipeline_mode = #tpu.pipeline_mode<synchronous>, transform_indices = @transform_2, window_bounds = array<i64: 96, 64>}, {pipeline_mode = #tpu.pipeline_mode<synchronous>, transform_indices = @transform_3, window_bounds = array<i64: 64, 64>}, {pipeline_mode = #tpu.pipeline_mode<synchronous>, transform_indices = @transform_4, window_bounds = array<i64: 1, 64>}, {pipeline_mode = #tpu.pipeline_mode<synchronous>, transform_indices = @transform_5, window_bounds = array<i64: 64, 128>}, {pipeline_mode = #tpu.pipeline_mode<synchronous>, transform_indices = @transform_6, window_bounds = array<i64: 1, 128>}, {transform_indices = @transform_7, window_bounds = array<i64: 8, 128>}]} {
    %c0 = arith.constant 0 : index
    %c0_0 = arith.constant 0 : index
    %0 = vector.load %arg1[%c0, %c0_0] : memref<8x96xf32, #tpu.memory_space<vmem>>, vector<8x96xf32>
    %1 = arith.truncf %0 : vector<8x96xf32> to vector<8x96xbf16>
    %c0_1 = arith.constant 0 : index
    %c0_2 = arith.constant 0 : index
    %2 = vector.load %arg3[%c0_1, %c0_2] : memref<96x64xbf16, #tpu.memory_space<vmem>>, vector<96x64xbf16>
    %cst = arith.constant dense<0.000000e+00> : vector<8x64xf32>
    %3 = tpu.matmul %1, %2, %cst {dimension_numbers = #tpu.dot_dimension_numbers<[1], [0], [0], [1], [0, 0, 1, 1], [], []>} : vector<8x96xbf16>, vector<96x64xbf16>, vector<8x64xf32> -> vector<8x64xf32>
    %c0_3 = arith.constant 0 : index
    %c0_4 = arith.constant 0 : index
    %4 = vector.load %arg2[%c0_3, %c0_4] : memref<8x64xf32, #tpu.memory_space<vmem>>, vector<8x64xf32>
    %5 = arith.truncf %4 : vector<8x64xf32> to vector<8x64xbf16>
    %c0_5 = arith.constant 0 : index
    %c0_6 = arith.constant 0 : index
    %6 = vector.load %arg4[%c0_5, %c0_6] : memref<64x64xbf16, #tpu.memory_space<vmem>>, vector<64x64xbf16>
    %cst_7 = arith.constant dense<0.000000e+00> : vector<8x64xf32>
    %7 = tpu.matmul %5, %6, %cst_7 {dimension_numbers = #tpu.dot_dimension_numbers<[1], [0], [0], [1], [0, 0, 1, 1], [], []>} : vector<8x64xbf16>, vector<64x64xbf16>, vector<8x64xf32> -> vector<8x64xf32>
    %8 = arith.addf %3, %7 : vector<8x64xf32>
    %c0_8 = arith.constant 0 : index
    %c0_9 = arith.constant 0 : index
    %9 = vector.load %arg5[%c0_8, %c0_9] : memref<1x64xf32, #tpu.memory_space<vmem>>, vector<1x64xf32>
    %10 = vector.broadcast %9 : vector<1x64xf32> to vector<8x64xf32>
    %11 = arith.addf %8, %10 : vector<8x64xf32>
    %12 = arith.mulf %11, %11 : vector<8x64xf32>
    %13 = arith.mulf %12, %11 : vector<8x64xf32>
    %cst_10 = arith.constant 5.000000e-01 : f32
    %14 = vector.broadcast %cst_10 : f32 to vector<8x64xf32>
    %15 = arith.mulf %14, %11 : vector<8x64xf32>
    %cst_11 = arith.constant 4.471500e-02 : f32
    %16 = vector.broadcast %cst_11 : f32 to vector<8x64xf32>
    %17 = arith.mulf %16, %13 : vector<8x64xf32>
    %18 = arith.addf %11, %17 : vector<8x64xf32>
    %cst_12 = arith.constant 0.797884583 : f32
    %19 = vector.broadcast %cst_12 : f32 to vector<8x64xf32>
    %20 = arith.mulf %19, %18 : vector<8x64xf32>
    %21 = math.tanh %20 : vector<8x64xf32>
    %cst_13 = arith.constant 1.000000e+00 : f32
    %22 = vector.broadcast %cst_13 : f32 to vector<8x64xf32>
    %23 = arith.addf %22, %21 : vector<8x64xf32>
    %24 = arith.mulf %15, %23 : vector<8x64xf32>
    %25 = arith.truncf %24 : vector<8x64xf32> to vector<8x64xbf16>
    %c0_14 = arith.constant 0 : index
    %c0_15 = arith.constant 0 : index
    %26 = vector.load %arg6[%c0_14, %c0_15] : memref<64x128xbf16, #tpu.memory_space<vmem>>, vector<64x128xbf16>
    %cst_16 = arith.constant dense<0.000000e+00> : vector<8x128xf32>
    %27 = tpu.matmul %25, %26, %cst_16 {dimension_numbers = #tpu.dot_dimension_numbers<[1], [0], [0], [1], [0, 0, 1, 1], [], []>} : vector<8x64xbf16>, vector<64x128xbf16>, vector<8x128xf32> -> vector<8x128xf32>
    %c0_17 = arith.constant 0 : index
    %c0_18 = arith.constant 0 : index
    %28 = vector.load %arg7[%c0_17, %c0_18] : memref<1x128xf32, #tpu.memory_space<vmem>>, vector<1x128xf32>
    %29 = vector.broadcast %28 : vector<1x128xf32> to vector<8x128xf32>
    %30 = arith.addf %27, %29 : vector<8x128xf32>
    %31 = arith.mulf %30, %30 : vector<8x128xf32>
    %32 = arith.mulf %31, %30 : vector<8x128xf32>
    %cst_19 = arith.constant 5.000000e-01 : f32
    %33 = vector.broadcast %cst_19 : f32 to vector<8x128xf32>
    %34 = arith.mulf %33, %30 : vector<8x128xf32>
    %cst_20 = arith.constant 4.471500e-02 : f32
    %35 = vector.broadcast %cst_20 : f32 to vector<8x128xf32>
    %36 = arith.mulf %35, %32 : vector<8x128xf32>
    %37 = arith.addf %30, %36 : vector<8x128xf32>
    %cst_21 = arith.constant 0.797884583 : f32
    %38 = vector.broadcast %cst_21 : f32 to vector<8x128xf32>
    %39 = arith.mulf %38, %37 : vector<8x128xf32>
    %40 = math.tanh %39 : vector<8x128xf32>
    %cst_22 = arith.constant 1.000000e+00 : f32
    %41 = vector.broadcast %cst_22 : f32 to vector<8x128xf32>
    %42 = arith.addf %41, %40 : vector<8x128xf32>
    %43 = arith.mulf %34, %42 : vector<8x128xf32>
    %c0_23 = arith.constant 0 : index
    %c0_24 = arith.constant 0 : index
    %44 = vector.load %arg8[%c0_23, %c0_24] : memref<8x128xf32, #tpu.memory_space<vmem>>, vector<8x128xf32>
    tpu.vector_store %arg8[%c0_23, %c0_24], %43 {strides = array<i32>} : memref<8x128xf32, #tpu.memory_space<vmem>>, vector<8x128xf32>,
    return
  }
  func.func @transform_0(%arg0: i32) -> (i32, i32) {
    %c0_i32 = arith.constant 0 : i32
    %c0_i32_0 = arith.constant 0 : i32
    return %arg0, %c0_i32 : i32, i32
  }
  func.func @transform_1(%arg0: i32) -> (i32, i32) {
    %c0_i32 = arith.constant 0 : i32
    %c0_i32_0 = arith.constant 0 : i32
    return %arg0, %c0_i32 : i32, i32
  }
  func.func @transform_2(%arg0: i32) -> (i32, i32) {
    %c0_i32 = arith.constant 0 : i32
    %c0_i32_0 = arith.constant 0 : i32
    %c0_i32_1 = arith.constant 0 : i32
    return %c0_i32, %c0_i32_0 : i32, i32
  }
  func.func @transform_3(%arg0: i32) -> (i32, i32) {
    %c0_i32 = arith.constant 0 : i32
    %c0_i32_0 = arith.constant 0 : i32
    %c0_i32_1 = arith.constant 0 : i32
    return %c0_i32, %c0_i32_0 : i32, i32
  }
  func.func @transform_4(%arg0: i32) -> (i32, i32) {
    %c0_i32 = arith.constant 0 : i32
    %c0_i32_0 = arith.constant 0 : i32
    %c0_i32_1 = arith.constant 0 : i32
    return %c0_i32, %c0_i32_0 : i32, i32
  }
  func.func @transform_5(%arg0: i32) -> (i32, i32) {
    %c0_i32 = arith.constant 0 : i32
    %c0_i32_0 = arith.constant 0 : i32
    %c0_i32_1 = arith.constant 0 : i32
    return %c0_i32, %c0_i32_0 : i32, i32
  }
  func.func @transform_6(%arg0: i32) -> (i32, i32) {
    %c0_i32 = arith.constant 0 : i32
    %c0_i32_0 = arith.constant 0 : i32
    %c0_i32_1 = arith.constant 0 : i32
    return %c0_i32, %c0_i32_0 : i32, i32
  }
  func.func @transform_7(%arg0: i32) -> (i32, i32) {
    %c0_i32 = arith.constant 0 : i32
    %c0_i32_0 = arith.constant 0 : i32
    return %arg0, %c0_i32 : i32, i32
  }
}

</mosaic_0001>

<bundles_post_ra>
// kernel: tpu_custom_call.1
= control target key start
LH: loop header
LB: loop body
LE: loop exit
PB: predicated region body
PF: predicated region fallthrough
CT: control target
= control target key end

     0   :  { %s1327_s0 = inlined_call_operand.hbm [shape: f32[20,96], index: 0, kind: input, shape index: {}]   ;;  %s1328_s1 = inlined_call_operand.hbm [shape: f32[20,64], index: 1, kind: input, shape index: {}]   ;;  %s1329_s2 = inlined_call_operand.vmem [shape: bf16[96,64], index: 2, kind: input, shape index: {}]   ;;  %s1330_s3 = inlined_call_operand.vmem [shape: bf16[64,64], index: 3, kind: input, shape index: {}]   ;;  %s1331_s4 = inlined_call_operand.vmem [shape: f32[1,64], index: 4, kind: input, shape index: {}]   ;;  %s1332_s5 = inlined_call_operand.vmem [shape: bf16[64,128], index: 5, kind: input, shape index: {}]   ;;  %s1333_s6 = inlined_call_operand.vmem [shape: f32[1,128], index: 6, kind: input, shape index: {}]   ;;  %s1334_s7 = inlined_call_operand.hbm [shape: f32[20,128], index: 7, kind: output, shape index: {}]  }
   0x1   :  { %1338 = sst [smem:[#allocation11_spill]] %s1327_s0 }
   0x2   :  { %12 = vsyncpa [#allocation3], 0 }
   0x3   :  { %14 = vsyncpa [#allocation3 + $0x1], 0 }
   0x4   :  { %15 = vsyncpa [#allocation6], 0 }
   0x5   :  { %17 = vsyncpa [#allocation6 + $0x1], 0 }
   0x6   :  { %18 = vsyncpa [#allocation4], 0 }
   0x7   :  { %20 = vsyncpa [#allocation4 + $0x1], 0  ;;  %s1060_s24 = smov 0   ;;  %s1062_s25 = smov 0  }
   0x8   :  { %s1064_s26 = smov 0   ;;  %s1066_s27 = smov 0  }
   0x9 LB: > { %s1081_s28 = sadd.s32 4294967295, %s1013_s27   ;;  %s721_s29 = sadd.s32 4294967294, %s1013_s27   ;;  %s1013_s27 = sphi %s1066_s27, %s1356_s27   ;;  %s1009_s26 = sphi %s1064_s26, %s1355_s26   ;;  %s1005_s25 = sphi %s1062_s25, %s1354_s25   ;;  %s1001_s24 = sphi %s1060_s24, %s1353_s24  }
   0xa   : > { %s1085_s30 = sadd.s32 1, %s1013_s27   ;;  %s33_s8 = sadd.s32 1, %s1009_s26 }
   0xb   : > { %s30_s9 = ssub.s32 %s1013_s27, %s1085_s30  ;;  %p40_p0 = scmp.ne.s32.totalorder %s1009_s26, %s1005_s25 }
   0xc   : > { %p31_p1 = scmp.eq.s32.totalorder %s30_s9, 0  ;;  %p41_p2 = scmp.eq.s32.totalorder %s1013_s27, 0 }
   0xd   : > { %p46_p3 = scmp.ne.s32.totalorder %s1005_s25, %s1001_s24  ;;  %p47_p4 = scmp.eq.s32.totalorder %s1081_s28, 0 }
   0xe   : > { %s1097_s10 = scalar_select %p31_p1, %s1009_s26, %s33_s8  }
   0xf   : > { %p1099_p5 = por %p41_p2, %p40_p0  ;;  %p1103_p6 = por %p47_p4, %p46_p3 }
  0x10   : > { %p201_p7 = scmp.eq.s32.totalorder %s1081_s28, 2  ;;  %p207_p8 = scmp.eq.s32.totalorder %s721_s29, 2 }
  0x11   : > { %s1340_s12 = scalar_select %p1103_p6, 1, 0 }
  0x12   : > { %p829_p9 = scmp.lt.s32.totalorder %s1013_s27, 3  ;;  %p1109_p10 = por %p201_p7, %p40_p0 }
  0x13   : > { %p1113_p11 = por %p207_p8, %p46_p3  ;;  %s1118_s15 = sand.u32 1, %s1009_s26  }
  0x14   : > { %s1341_s13 = scalar_select %p1109_p10, 1, 0 }
  0x15   : > { %s1342_s14 = scalar_select %p1113_p11, 1, 0 }
  0x16   : > { %s725_s16 = sshll.u32 %s1013_s27, 7  ;;  %s1335_s17 = sshll.u32 %s1118_s15, 3 }
  0x17   : > { %s1343_s0 = sld [smem:[#allocation11_spill]]  ;;  %s246_s21 = scalar_lea.vmem [#allocation2], %s1335_s17 }
  0x18   : > { %s253_s22 = sshll.u32 %s246_s21, 4  ;;  %p1133_p12 = pnand %p829_p9, %p1099_p5  ;;  %s1137_s22 = int_to_ptr.vmem [resolvable:$true] %s253_s22 }
  0x19   : > { %s243_s29 = scalar_lea.sflag [#allocation3], %s1118_s15 }
  0x1a   : > { %p885_p2 = pneg %p1133_p12 }
  0x1d   : > { %s1127_s20 = scalar_lea.hbm %s1343_s0, %s725_s16  ;;  %s888_s18 = scalar_lea.hbm %s1343_s0, 384 }
  0x1e   : > { %s883_s8 = scalar_lea.hbm %s1127_s20, 128  ;;  %p889_p5 = scmp.lt.u32.totalorder %s1127_s20, %s1343_s0 }
  0x1f   : > { %p884_p1 = scmp.ne.s32.totalorder %s1127_s20, %s883_s8  ;;  %p890_p7 = scmp.lt.u32.totalorder %s888_s18, %s883_s8 }
  0x20   : > { %p892_p9 = scmp.lt.u32.totalorder %s883_s8, %s1127_s20 }
  0x21   : > { %p886_p3 = pnand %p885_p2, %p884_p1  ;;  %p891_p8 = por %p890_p7, %p889_p5 }
  0x23   : > { %p887_p4 = pneg %p886_p3  ;;  %p893_p13 = por %p892_p9, %p891_p8 }
  0x25   : > { %p894_p0 = pnand %p893_p13, %p887_p4 }
  0x27   : > { %897 = shalt.err (!%p894_p0)
}
  0x28   : > { %s898_s17 = scalar_lea.vmem %s1137_s22, 128  ;;  %s1015_s9 = smov [#allocation2]  }
  0x29   : > { %p899_p1 = scmp.ne.s32.totalorder %s1137_s22, %s898_s17  ;;  %s903_s11 = sshll.u32 %s1015_s9, 4  ;;  %s904_s11 = int_to_ptr.vmem [resolvable:$false] %s903_s11 }
  0x2a   : > { %s905_s19 = scalar_lea.vmem %s904_s11, 256  ;;  %p906_p10 = scmp.lt.s32.totalorder %s1137_s22, %s904_s11 }
  0x2b   : > { %p901_p3 = pnand %p899_p1, %p885_p2  ;;  %p907_p5 = scmp.lt.s32.totalorder %s905_s19, %s898_s17 }
  0x2d   : > { %p902_p11 = pneg %p901_p3  ;;  %p908_p7 = por %p907_p5, %p906_p10 }
  0x2f   : > { %p909_p8 = pnand %p908_p7, %p902_p11 }
  0x31   : > { %912 = shalt.err (!%p909_p8)
}
  0x32   : > { %821 = dma.hbm_to_vmem [thread:$0]  (!%p1133_p12), %s1127_s20, 128, %s1137_s22, %s243_s29  }
  0x33   : > { %p1345_p13 = scmp.lt.s32.totalorder %s1013_s27, 4  ;;  %p1346_p0 = scmp.ge.s32.totalorder %s1013_s27, 1 }
  0x34   : > { %s1180_s21 = scalar_lea.hbm %s1328_s1, %s725_s16  ;;  %s1348_s9 = sshll.u32 %s1118_s15, 3 }
  0x35   : > { %p1171_p4 = pnand %p1346_p0, %p1345_p13  ;;  %s264_s11 = scalar_lea.vmem [#allocation5], %s1348_s9 }
  0x36   : > { %s271_s19 = sshll.u32 %s264_s11, 4  ;;  %s261_s20 = scalar_lea.sflag [#allocation6], %s1118_s15  ;;  %s272_s19 = int_to_ptr.vmem [resolvable:$true] %s271_s19 }
  0x37   : > { %s1347_s8 = scalar_select %p1171_p4, 1, 0 }
  0x38   : > { %s913_s22 = scalar_lea.hbm %s1180_s21, 128  ;;  %s918_s16 = scalar_lea.hbm %s1328_s1, 384 }
  0x39   : > { %p914_p10 = scmp.ne.s32.totalorder %s1180_s21, %s913_s22  ;;  %p919_p1 = scmp.lt.u32.totalorder %s1180_s21, %s1328_s1 }
  0x3a   : > { %p920_p3 = scmp.lt.u32.totalorder %s918_s16, %s913_s22  ;;  %p922_p7 = scmp.lt.u32.totalorder %s913_s22, %s1180_s21 }
  0x3b   : > { %p916_p11 = pnand %p914_p10, %p885_p2 }
  0x3c   : > { %p921_p5 = por %p920_p3, %p919_p1 }
  0x3d   : > { %p917_p9 = pneg %p916_p11 }
  0x3e   : > { %p923_p8 = por %p922_p7, %p921_p5 }
  0x40   : > { %p924_p13 = pnand %p923_p8, %p917_p9 }
  0x42   : > { %927 = shalt.err (!%p924_p13)
}
  0x43   : > { %s928_s15 = scalar_lea.vmem %s272_s19, 128  ;;  %s1016_s9 = smov [#allocation5]  }
  0x44   : > { %p929_p0 = scmp.ne.s32.totalorder %s272_s19, %s928_s15  ;;  %s933_s0 = sshll.u32 %s1016_s9, 4  ;;  %s934_s0 = int_to_ptr.vmem [resolvable:$false] %s933_s0 }
  0x45   : > { %s935_s11 = scalar_lea.vmem %s934_s0, 256  ;;  %p936_p6 = scmp.lt.s32.totalorder %s272_s19, %s934_s0 }
  0x46   : > { %p931_p10 = pnand %p929_p0, %p885_p2  ;;  %p937_p4 = scmp.lt.s32.totalorder %s935_s11, %s928_s15 }
  0x48   : > { %p932_p11 = pneg %p931_p10  ;;  %p938_p1 = por %p937_p4, %p936_p6 }
  0x4a   : > { %p939_p3 = pnand %p938_p1, %p932_p11 }
  0x4c   : > { %942 = shalt.err (!%p939_p3)
}
  0x4d   : > { %824 = dma.hbm_to_vmem [thread:$0]  (!%p1133_p12), %s1180_s21, 128, %s272_s19, %s261_s20  }
  0x4e   : > { %p1349_p9 = scmp.ne.s32.totalorder %s1347_s8, 0 }
  0x4f   : > { %s1207_s22 = sand.u32 (!%p1349_p9), 1, %s1005_s25   ;;  %p1350_p6 = scmp.ne.s32.totalorder (!%p1349_p9), %s1340_s12, 0 }
  0x50   : > { %280 = sbr.rel (%p1349_p9) target bundleno = 612 (0x264), region = 48  ;;  %s1210_s29 = sshll.u32 (!%p1349_p9), %s1207_s22, 3 }
  0x51   : > { %s283_s16 = scalar_lea.sflag (!%p1349_p9), [#allocation3], %s1207_s22  ;;  %s286_s17 = scalar_lea.vmem (!%p1349_p9), [#allocation2], %s1210_s29 }
  0x57   : > { %988 = dma.done.wait (%p1350_p6), %s283_s16, 128  }
  0x58   : > { %990 = vsyncadd (%p1350_p6), %s283_s16, 4294967168  ;;  %s292_s23 = scalar_lea.sflag [#allocation6], %s1207_s22  ;;  %s295_s8 = scalar_lea.vmem [#allocation5], %s1210_s29 }
  0x59   : > { %992 = dma.done.wait (%p1350_p6), %s292_s23, 128  }
  0x5a   : > { %994 = vsyncadd (%p1350_p6), %s292_s23, 4294967168  ;;  %v1017_v0 = vmov 0.0   ;;  %vm1018_vm0 = vmmov 0   ;;  %v865_v1 = vld [vmem:[%s1329_s2] sm:$0xff]   ;;  %v866_v2 = vld [vmem:[%s1329_s2 + $0x8] sm:$0xff]   ;;  %vm380_vm1 = vcmask 523264  }
  0x5b   : > { %784 = vmatprep.subr.bf16.mxu1 %v1017_v0  ;;  %772 = vmatprep.subr.bf16.mxu0 %v1017_v0  ;;  %v867_v3 = vld [vmem:[%s1330_s3] sm:$0xff]   ;;  %v869_v4 = vld [vmem:[%s1330_s3 + $0x8] sm:$0xff]   ;;  %v868_v5 = vld [vmem:[%s1329_s2 + $0x10] sm:$0xff]   ;;  %vm460_vm2 = vcmask 785408   ;;  %s752_s11 = sshll.u32 %s1081_s28, 7  ;;  %s615_s19 = scalar_lea.sflag [#allocation4], %s1207_s22 }
  0x5c   : > { %780 = vmatprep.mubr.msk.bf16.mxu0 %vm1018_vm0, %v1017_v0  ;;  %796 = vmatprep.mubr.msk.bf16.mxu1 %vm1018_vm0, %v1017_v0  ;;  %v871_v6 = vld [vmem:[%s1330_s3 + $0x10] sm:$0xff]   ;;  %v870_v7 = vld [vmem:[%s1329_s2 + $0x18] sm:$0xff]   ;;  %v872_v10 = vld [vmem:[%s1329_s2 + $0x20] sm:$0xff]   ;;  %p1351_p2 = scmp.ne.s32.totalorder %s1341_s13, 0  ;;  %s1019_s28 = smov [#allocation7]  }
  0x5d   : > { %785 = vmatpush3.bf16.msra.mxu1 %v865_v1  ;;  %773 = vmatpush3.bf16.msra.mxu0 %v867_v3  ;;  %v873_v8 = vld [vmem:[%s1330_s3 + $0x18] sm:$0xff]   ;;  %v874_v12 = vld [vmem:[%s1329_s2 + $0x28] sm:$0xff]   ;;  %v875_v15 = vld [vmem:[%s1332_s5] sm:$0xff]  }
  0x5e   : > { %786 = vmatprep.subr.bf16.mxu1 %v1017_v0  ;;  %774 = vmatprep.subr.bf16.mxu0 %v1017_v0  ;;  %v346_v9 = vld [vmem:[%s295_s8] sm:$0xff]  ;;  %v332_v13 = vld [vmem:[%s286_s17] sm:$0xff]  ;;  %s330_s8 = scalar_lea.vmem [#allocation7], %s1210_s29  ;;  %s1284_s17 = scalar_lea.hbm %s1334_s7, %s752_s11 }
  0x5f   : > { %v347_v11 = vpack.c.bf16 %v346_v9, %v346_v9  ;;  %v333_v14 = vpack.c.bf16 %v332_v13, %v332_v13  ;;  %v876_v16 = vld [vmem:[%s1332_s5 + $0x8] sm:$0xff]   ;;  %v877_v17 = vld [vmem:[%s1332_s5 + $0x10] sm:$0xff]   ;;  %v878_v18 = vld [vmem:[%s1332_s5 + $0x18] sm:$0xff]   ;;  %s628_s16 = sshll.u32 %s330_s8, 4  ;;  %s947_s29 = sshll.u32 %s1019_s28, 4  ;;  %s1286_s16 = int_to_ptr.vmem [resolvable:$true] %s628_s16  ;;  %s948_s29 = int_to_ptr.vmem [resolvable:$false] %s947_s29 }
  0x60   : > { %v744_v24 = vld [vmem:[%s1331_s4] ss:$0 sm:$0xff]  ;;  %s943_s20 = scalar_lea.vmem %s1286_s16, 128  ;;  %s949_s18 = scalar_lea.vmem %s948_s29, 256 }
  0x61   : > { %787 = vmatpush3.bf16.msra.mxu1 %v866_v2  ;;  %775 = vmatpush3.bf16.msra.mxu0 %v869_v4  ;;  %v745_v40 = vld [vmem:[%s1333_s6] ss:$0 sm:$0xff]  ;;  %p944_p12 = scmp.ne.s32.totalorder %s1286_s16, %s943_s20  ;;  %p950_p7 = scmp.lt.s32.totalorder %s1286_s16, %s948_s29 }
  0x62   : > { %788 = vmatprep.subr.bf16.mxu1 %v1017_v0  ;;  %776 = vmatprep.subr.bf16.mxu0 %v1017_v0  ;;  %p951_p8 = scmp.lt.s32.totalorder %s949_s18, %s943_s20 }
  0x63   : > { %p945_p4 = pnand %p944_p12, %p1351_p2 }
  0x64   : > { %p952_p13 = por %p951_p8, %p950_p7 }
  0x65   : > { %789 = vmatpush3.bf16.msra.mxu1 %v868_v5  ;;  %777 = vmatpush3.bf16.msra.mxu0 %v871_v6  ;;  %p946_p5 = pneg %p945_p4 }
  0x66   : > { %790 = vmatprep.subr.bf16.mxu1 %v1017_v0  ;;  %778 = vmatprep.subr.bf16.mxu0 %v1017_v0 }
  0x67   : > { %p953_p0 = pnand %p952_p13, %p946_p5 }
  0x69   : > { %791 = vmatpush3.bf16.msra.mxu1 %v870_v7  ;;  %779 = vmatpush3.bf16.msra.mxu0 %v873_v8 }
  0x6a   : > { %792 = vmatprep.subr.bf16.mxu1 %v1017_v0  ;;  %800 = vmatprep.subr.bf16.mxu0 %v1017_v0 }
  0x6c   : > { %781 = vmatmul.mubr.msk.bf16.vlgmr.msra.gmra.mrb[0].mxu0 %vm380_vm1, %v347_v11 }
  0x6d   : > { %793 = vmatpush3.bf16.msra.mxu1 %v872_v10  ;;  %808 = vmatprep.mubr.msk.bf16.mxu0 %vm1018_vm0, %v1017_v0 }
  0x6e   : > { %794 = vmatprep.subr.bf16.mxu1 %v1017_v0  ;;  %801 = vmatpush3.bf16.msra.mxu0 %v875_v15 }
  0x6f   : > { %802 = vmatprep.subr.bf16.mxu0 %v1017_v0 }
  0x71   : > { %795 = vmatpush3.bf16.msra.mxu1 %v874_v12 }
  0x72   : > { %803 = vmatpush3.bf16.msra.mxu0 %v876_v16 }
  0x73   : > { %804 = vmatprep.subr.bf16.mxu0 %v1017_v0 }
  0x74   : > { %797 = vmatmul.mubr.msk.bf16.vlgmr.msra.gmra.mrb[0].mxu1 %vm460_vm2, %v333_v14 }
  0x76   : > { %805 = vmatpush3.bf16.msra.mxu0 %v877_v17 }
  0x77   : > { %806 = vmatprep.subr.bf16.mxu0 %v1017_v0 }
  0x7a   : > { %807 = vmatpush3.bf16.msra.mxu0 %v878_v18 }
 0x13f   : > { %v418_v19 = vpop.f32.mrb[0].mxu0 }
 0x140   : > { %v782_v20 = vpop.f32.mrb[1].mxu0 }
 0x141   : > { %v421_v21 = vpop.f32.mrb[2].mxu0 }
 0x142   : > { %v783_v22 = vpop.f32.mrb[3].mxu0 }
 0x147   : > { %v498_v23 = vpop.f32.mrb[0].mxu1 }
 0x148   : > { %v499_v25 = vadd.f32 %v498_v23, %v418_v19  ;;  %v798_v26 = vpop.f32.mrb[1].mxu1 }
 0x149   : > { %v501_v27 = vpop.f32.mrb[2].mxu1 }
 0x14a   : > { %v511_v28 = vadd.f32 %v744_v24, %v499_v25  ;;  %v799_v29 = vpop.f32.mrb[3].mxu1 }
 0x14c   : > { %v512_v30 = vmul.f32 %v511_v28, %v511_v28  ;;  %v514_v36 = vmul.f32 0.5, %v511_v28 }
 0x14e   : > { %v513_v31 = vmul.f32 %v512_v30, %v511_v28 }
 0x150   : > { %v515_v32 = vmul.f32 0.044715, %v513_v31 }
 0x152   : > { %v516_v33 = vadd.f32 %v515_v32, %v511_v28 }
 0x154   : > { %v517_v34 = vmul.f32 0.7978846, %v516_v33 }
 0x156   : > { %879 = vtanh.f32 %v517_v34 }
 0x160   : > { %v880_v35 = vpop.eup %879 }
 0x161   : > { %v519_v37 = vadd.f32 1.0, %v880_v35 }
 0x163   : > { %v520_v38 = vmul.f32 %v519_v37, %v514_v36 }
 0x165   : > { %v521_v39 = vpack.c.bf16 %v520_v38, %v520_v38 }
 0x167   : > { %809 = vmatmul.mubr.msk.bf16.vlgmr.msra.gmra.mrb[4].mxu0 %vm380_vm1, %v521_v39 }
 0x23a   : > { %v598_v41 = vpop.f32.mrb[4].mxu0 }
 0x23b   : > { %v599_v42 = vadd.f32 %v745_v40, %v598_v41  ;;  %v810_v43 = vpop.f32.mrb[5].mxu0 }
 0x23c   : > { %v601_v44 = vpop.f32.mrb[6].mxu0 }
 0x23d   : > { %v604_v45 = vmul.f32 %v599_v42, %v599_v42  ;;  %v811_v46 = vpop.f32.mrb[7].mxu0  ;;  %v606_v52 = vmul.f32 0.5, %v599_v42 }
 0x23f   : > { %v605_v47 = vmul.f32 %v604_v45, %v599_v42 }
 0x241   : > { %v607_v48 = vmul.f32 0.044715, %v605_v47 }
 0x243   : > { %v608_v49 = vadd.f32 %v607_v48, %v599_v42 }
 0x245   : > { %v609_v50 = vmul.f32 0.7978846, %v608_v49 }
 0x247   : > { %881 = vtanh.f32 %v609_v50 }
 0x251   : > { %v882_v51 = vpop.eup %881 }
 0x252   : > { %v611_v53 = vadd.f32 1.0, %v882_v51 }
 0x254   : > { %v612_v54 = vmul.f32 %v611_v53, %v606_v52 }
 0x256   : > { %613 = vst [vmem:[%s330_s8] sm:$0xff] %v612_v54 }
 0x257   : > { %956 = shalt.err (!%p953_p0)
}
 0x258   : > { %s957_s22 = scalar_lea.hbm %s1284_s17, 128  ;;  %s961_s9 = scalar_lea.hbm %s1334_s7, 384 }
 0x259   : > { %p958_p10 = scmp.ne.s32.totalorder %s1284_s17, %s957_s22  ;;  %p962_p3 = scmp.lt.u32.totalorder %s1284_s17, %s1334_s7 }
 0x25a   : > { %p963_p9 = scmp.lt.u32.totalorder %s961_s9, %s957_s22  ;;  %p965_p12 = scmp.lt.u32.totalorder %s957_s22, %s1284_s17 }
 0x25b   : > { %p959_p11 = pnand %p958_p10, %p1351_p2 }
 0x25c   : > { %p964_p6 = por %p963_p9, %p962_p3 }
 0x25d   : > { %p960_p1 = pneg %p959_p11 }
 0x25e   : > { %p966_p4 = por %p965_p12, %p964_p6 }
 0x260   : > { %p967_p5 = pnand %p966_p4, %p960_p1 }
 0x262   : > { %970 = shalt.err (!%p967_p5)
}
 0x263   : > { %816 = dma.vmem_to_hbm [thread:$0]  (%p1351_p2), %s1286_s16, 128, %s1284_s17, %s615_s19  }
 0x264 PF: > { %p830_p7 = scmp.ge.s32.totalorder %s1013_s27, 2  ;;  %s640_s8 = sand.u32 1, %s1001_s24  }
 0x265   : > { %p1352_p8 = scmp.ne.s32.totalorder %s1342_s14, 0  ;;  %s641_s23 = scalar_lea.sflag [#allocation4], %s640_s8 }
 0x267   : > { %p826_p13 = pnand %p830_p7, %p1352_p8 }
 0x269   : > { %996 = dma.done.wait (!%p826_p13), %s641_s23, 128  }
 0x26a   : > { %998 = vsyncadd (!%p826_p13), %s641_s23, 4294967168  ;;  %p23_p0 = scmp.ge.s32.totalorder %s1085_s30, 5   ;;  %s1353_s24 = smov %s1005_s25 }
 0x26b   : > { %s1354_s25 = smov %s1009_s26  ;;  %s1355_s26 = smov %s1097_s10 }
 0x26c   : > { %s1356_s27 = smov %s1085_s30  ;;  %25 = sbr.rel (!%p23_p0) target bundleno = 9 (0x9), region = 106 }
 0x273   :  { %646 = vsyncpa [#allocation3], 1 }
 0x274   :  { %648 = vsyncpa [#allocation3 + $0x1], 1 }
 0x275   :  { %649 = vsyncpa [#allocation6], 1 }
 0x276   :  { %651 = vsyncpa [#allocation6 + $0x1], 1 }
 0x277   :  { %652 = vsyncpa [#allocation4], 1 }
 0x278   :  { %654 = vsyncpa [#allocation4 + $0x1], 1 }

</bundles_post_ra>
